<compile_context>
chip_gen: v5e
topology: v5e:2x2
jax: 0.10.0
libtpu: 0.0.40
codegen_flags: <defaults>
</compile_context>

<pallas_src>
import jax
import jax.numpy as jnp
from jax.experimental import pallas as pl
from jax.experimental.pallas import tpu as pltpu


# ---------------------------------------------------------------------------
# Kernels
# ---------------------------------------------------------------------------

def _linear_tiled_kernel(x_ref, w_ref, b_ref, o_ref):
    """One (tm, tn) output tile; grid axis 2 walks the K reduction.

    The f32 output block is the accumulator (same (i, j) block for every k
    step => resident in VMEM across the reduction), so no scratch is needed.
    """
    kk = pl.program_id(2)

    @pl.when(kk == 0)
    def _():
        o_ref[...] = jnp.zeros_like(o_ref)

    # Hot path: pure MXU matmul on bf16 operands, f32 accumulation.
    o_ref[...] += jnp.dot(x_ref[...], w_ref[...], preferred_element_type=jnp.float32)

    @pl.when(kk == pl.num_programs(2) - 1)
    def _():
        # Bias added once, in the finalize step (keeps the inner loop MXU-only).
        o_ref[...] += b_ref[...]


def _linear_small_kernel(x_ref, w_ref, b_ref, o_ref):
    """Single-block fast path: whole problem lives in VMEM, f32 operands."""
    o_ref[...] = (
        jnp.dot(x_ref[...], w_ref[...], preferred_element_type=jnp.float32)
        + b_ref[...]
    ).astype(o_ref.dtype)


# ---------------------------------------------------------------------------
# Tiling helpers
# ---------------------------------------------------------------------------

def _round_up(v, m):
    return ((v + m - 1) // m) * m


def _tile_caps():
    """Per-generation tile caps + VMEM limit.  Unknown HW -> v7x-safe sizing."""
    kind = ""
    try:
        kind = jax.devices()[0].device_kind.lower()
    except Exception:
        pass
    if "v6" in kind:
        # 128 MiB VMEM, ~650 flops/byte HBM/MXU balance -> big output tiles.
        return dict(tm=1024, tn=2048, tk=512, vmem=64 * 1024 * 1024)
    if "v5 lite" in kind or "v5e" in kind:
        # ~240 flops/byte balance; 512x512 tiles already compute-bound.
        return dict(tm=512, tn=512, tk=512, vmem=32 * 1024 * 1024)
    # v7x (and default fallback): 64 MiB VMEM -> keep live working set modest.
    return dict(tm=512, tn=1024, tk=512, vmem=48 * 1024 * 1024)


def _pick_tile(dim, cap, gran):
    """Largest tile <= cap (multiple of `gran`) that avoids pathological padding."""
    if dim <= cap:
        return _round_up(dim, gran)
    candidates = [cap, max(gran, cap // 2), max(gran, cap // 4)]
    best, best_waste = None, None
    for t in candidates:
        waste = (_round_up(dim, t) - dim) / dim
        if waste <= 0.15:
            return t
        if best_waste is None or waste < best_waste:
            best, best_waste = t, waste
    return best


# Total f32 elements (x + W + out) below which the single-block fast path is used.
_SMALL_LIMIT = 512 * 1024


# ---------------------------------------------------------------------------
# Public API
# ---------------------------------------------------------------------------

def make_my_linear(weights, bias):
    """Returns `f(x) = x @ weights + bias` backed by Pallas TPU kernels.

    Weight/bias padding + bf16 cast happen ONCE here (hoisted out of the
    per-call path) and are reused by every call.
    """
    k, n = weights.shape
    assert bias.shape == (n,), "bias must be (out_features,)"
    caps = _tile_caps()

    tn = _pick_tile(n, caps["tn"], 128)
    tk = _pick_tile(k, caps["tk"], 128)
    n_p = _round_up(n, tn)
    k_p = _round_up(k, tk)

    # Megacore / v7x: if N fits a single tile, split it so the second
    # TensorCore still gets work for small-batch (single M block) calls.
    if n_p // tn == 1 and n >= 256:
        tn2 = _round_up(-(-n // 2), 128)
        n_p2 = _round_up(n, tn2)
        if n_p2 // tn2 >= 2 and (n_p2 - n) / n <= 0.25:
            tn, n_p = tn2, n_p2

    # Hoisted prep: pad to tile multiples, bf16 weights, f32 row-vector bias.
    w_p = weights if (k_p, n_p) == (k, n) else jnp.pad(
        weights, ((0, k_p - k), (0, n_p - n)))
    w_p = w_p.astype(jnp.bfloat16)
    b_row = bias if n_p == n else jnp.pad(bias, (0, n_p - n))
    b_p = b_row.astype(jnp.float32).reshape(1, n_p)
    b_small = bias.reshape(1, n)  # unpadded, original dtype, for the fast path

    vmem_spec = pl.BlockSpec(memory_space=pltpu.MemorySpace.VMEM)

    def apply(x):
        assert x.ndim == 2 and x.shape[1] == k, "expected (batch, in_features)"
        m = x.shape[0]
        out_dtype = x.dtype

        # ---- Tiny problems: one VMEM block, f32 operands, no padding/grid ----
        if m * k + k * n + m * n <= _SMALL_LIMIT:
            return pl.pallas_call(
                _linear_small_kernel,
                out_shape=jax.ShapeDtypeStruct((m, n), out_dtype),
                in_specs=[vmem_spec, vmem_spec, vmem_spec],
                out_specs=vmem_spec,
            )(x, weights, b_small)

        # ---- Tiled path ----
        tm = _pick_tile(m, caps["tm"], 16)  # 16: bf16 sublane packing
        m_p = _round_up(m, tm)

        x_p = x if (m_p, k_p) == (m, k) else jnp.pad(
            x, ((0, m_p - m), (0, k_p - k)))
        x_p = x_p.astype(jnp.bfloat16)

        grid = (m_p // tm, n_p // tn, k_p // tk)

        # bytes_accessed accounts for re-reads: x once per N block, W once per
        # M block, plus the f32 output write.
        cost = pl.CostEstimate(
            flops=2 * m_p * n_p * k_p,
            transcendentals=0,
            bytes_accessed=(
                x_p.size * 2 * grid[1]
                + w_p.size * 2 * grid[0]
                + b_p.size * 4
                + m_p * n_p * 4
            ),
        )

        out = pl.pallas_call(
            _linear_tiled_kernel,
            out_shape=jax.ShapeDtypeStruct((m_p, n_p), jnp.float32),
            grid_spec=pltpu.PrefetchScalarGridSpec(
                num_scalar_prefetch=0,
                grid=grid,
                in_specs=[
                    pl.BlockSpec((tm, tk), lambda i, j, kk: (i, kk)),
                    pl.BlockSpec((tk, tn), lambda i, j, kk: (kk, j)),
                    pl.BlockSpec((1, tn), lambda i, j, kk: (0, j)),
                ],
                out_specs=pl.BlockSpec((tm, tn), lambda i, j, kk: (i, j)),
            ),
            compiler_params=pltpu.CompilerParams(
                dimension_semantics=("parallel", "parallel", "arbitrary"),
                vmem_limit_bytes=caps["vmem"],
            ),
            cost_estimate=cost,
        )(x_p, w_p, b_p)

        if (m_p, n_p) != (m, n):
            out = out[:m, :n]
        return out.astype(out_dtype)

    return apply


def my_linear(x, weights, bias):
    """One-shot convenience wrapper (use make_my_linear for repeated calls)."""
    return make_my_linear(weights, bias)(x)


# ---------------------------------------------------------------------------
# Demo / correctness check
# ---------------------------------------------------------------------------

if __name__ == "__main__":
    key = jax.random.PRNGKey(0)
    kx1, kw1, kb1, kx2, kw2, kb2 = jax.random.split(key, 6)

    # --- Test 1: MyLinear-style small shapes (hits the single-block fast path) ---
    batch, in_features, out_features = 8, 32, 64
    x = jax.random.normal(kx1, (batch, in_features), dtype=jnp.float32)
    weights = jax.random.normal(kw1, (in_features, out_features), dtype=jnp.float32)
    bias = jax.random.normal(kb1, (out_features,), dtype=jnp.float32)

    linear = make_my_linear(weights, bias)
    out = linear(x)
    jax.block_until_ready(out)

    ref = jnp.dot(x, weights, precision=jax.lax.Precision.HIGHEST) + bias
    assert out.shape == (batch, out_features)
    assert out.dtype == jnp.float32
    assert jnp.allclose(out, ref, atol=1e-1, rtol=1e-2), float(
        jnp.max(jnp.abs(out - ref)))

    # --- Test 2: exercise the tiled / padded multi-block path ---
    m2, kdim2, n2 = 300, 1100, 640
    x2 = jax.random.normal(kx2, (m2, kdim2), dtype=jnp.float32)
    w2 = jax.random.normal(kw2, (kdim2, n2), dtype=jnp.float32)
    b2 = jax.random.normal(kb2, (n2,), dtype=jnp.float32)

    out2 = make_my_linear(w2, b2)(x2)
    jax.block_until_ready(out2)

    ref2 = jnp.dot(x2, w2, precision=jax.lax.Precision.HIGHEST) + b2
    assert out2.shape == (m2, n2)
    # bf16 operands (f32 accumulation): error grows ~sqrt(K); bound is generous.
    tol2 = 0.03 * (kdim2 ** 0.5)
    assert jnp.allclose(out2, ref2, atol=tol2, rtol=2e-2), float(
        jnp.max(jnp.abs(out2 - ref2)))

    print("KERNEL_OK")
</pallas_src>

<mosaic_0001>
module attributes {stable_mosaic.version = 11 : i64} {
  func.func @_linear_small_kernel(%arg0: memref<8x32xf32, #tpu.memory_space<vmem>>, %arg1: memref<32x64xf32, #tpu.memory_space<vmem>>, %arg2: memref<1x64xf32, #tpu.memory_space<vmem>>, %arg3: memref<8x64xf32, #tpu.memory_space<vmem>>) attributes {dimension_semantics = [], scalar_prefetch = 0 : i64, scratch_operands = 0 : i64, tpu.core_type = #tpu.core_type<tc>} {
    %c0 = arith.constant 0 : index
    %c0_0 = arith.constant 0 : index
    %0 = vector.load %arg0[%c0, %c0_0] : memref<8x32xf32, #tpu.memory_space<vmem>>, vector<8x32xf32>
    %c0_1 = arith.constant 0 : index
    %c0_2 = arith.constant 0 : index
    %1 = vector.load %arg1[%c0_1, %c0_2] : memref<32x64xf32, #tpu.memory_space<vmem>>, vector<32x64xf32>
    %cst = arith.constant dense<0.000000e+00> : vector<8x64xf32>
    %2 = tpu.matmul %0, %1, %cst {dimension_numbers = #tpu.dot_dimension_numbers<[1], [0], [0], [1], [0, 0, 1, 1], [], []>} : vector<8x32xf32>, vector<32x64xf32>, vector<8x64xf32> -> vector<8x64xf32>
    %c0_3 = arith.constant 0 : index
    %c0_4 = arith.constant 0 : index
    %3 = vector.load %arg2[%c0_3, %c0_4] : memref<1x64xf32, #tpu.memory_space<vmem>>, vector<1x64xf32>
    %4 = vector.broadcast %3 : vector<1x64xf32> to vector<8x64xf32>
    %5 = arith.addf %2, %4 : vector<8x64xf32>
    %c0_5 = arith.constant 0 : index
    %c0_6 = arith.constant 0 : index
    %6 = vector.load %arg3[%c0_5, %c0_6] : memref<8x64xf32, #tpu.memory_space<vmem>>, vector<8x64xf32>
    tpu.vector_store %arg3[%c0_5, %c0_6], %5 {strides = array<i32>} : memref<8x64xf32, #tpu.memory_space<vmem>>, vector<8x64xf32>,
    return
  }
}

</mosaic_0001>

<bundles_post_ra>
// kernel: tpu_custom_call.1
= control target key start
LH: loop header
LB: loop body
LE: loop exit
PB: predicated region body
PF: predicated region fallthrough
CT: control target
= control target key end

     0   :  { %8 = vsyncpa [#allocation3], 0  ;;  %s220_s0 = inlined_call_operand.hbm [shape: f32[8,32], index: 0, kind: input, shape index: {}]   ;;  %s221_s1 = inlined_call_operand.hbm [shape: f32[32,64], index: 1, kind: input, shape index: {}]   ;;  %s222_s2 = inlined_call_operand.vmem [shape: f32[1,64], index: 2, kind: input, shape index: {}]   ;;  %s223_s3 = inlined_call_operand.hbm [shape: f32[8,64], index: 3, kind: output, shape index: {}]  }
   0x1   :  { %9 = vsyncpa [#allocation6], 0 }
   0x2   :  { %10 = vsyncpa [#allocation4], 0  ;;  %s16_s14 = sshll.u32 %s220_s0, 4  ;;  %s183_s15 = smov [#allocation2]   ;;  %s17_s14 = int_to_ptr.hbm [resolvable:$true] %s16_s14 }
   0x3   :  { %s18_s16 = sshll.u32 %s183_s15, 4  ;;  %s26_s19 = sshll.u32 %s221_s1, 4  ;;  %s19_s16 = int_to_ptr.vmem [resolvable:$true] %s18_s16  ;;  %s27_s19 = int_to_ptr.hbm [resolvable:$true] %s26_s19 }
   0x4   :  { %21 = dma.hbm_to_vmem [thread:$0]  %s17_s14, 128, %s19_s16, [#allocation3]  }
   0x5   :  { %s184_s20 = smov [#allocation5]   ;;  %s185_s22 = smov 128  }
   0x6   :  { %s28_s21 = sshll.u32 %s184_s20, 4  ;;  %s186_s23 = smov 8   ;;  %s29_s21 = int_to_ptr.vmem [resolvable:$true] %s28_s21 }
   0x7   :  { %34 = dma.hbm_to_vmem [thread:$0]  %s27_s19, 512, %s29_s21, [#allocation6], %s185_s22, %s185_s22, %s186_s23  }
   0x8   :  { %177 = dma.done.wait [#allocation3], 128  }
   0x9   :  { %178 = vsyncadd [#allocation3], 4294967168 }
   0xa   :  { %179 = dma.done.wait [#allocation6], 512  }
   0xb   :  { %180 = vsyncadd [#allocation6], 4294966784  ;;  %v49_v0 = vld [vmem:[#allocation5 + $0x18] sm:$0xff]  ;;  %v48_v1 = vld [vmem:[#allocation5 + $0x10] sm:$0xff]  ;;  %vm54_vm0 = vcmask 261120   ;;  %s187_s24 = smov [#allocation7]  }
   0xc   :  { %70 = vmatpush.msra.mxu0 %v49_v0  ;;  %v47_v2 = vld [vmem:[#allocation5 + $0x8] sm:$0xff]  ;;  %v46_v3 = vld [vmem:[#allocation5] sm:$0xff]  ;;  %v45_v4 = vld [vmem:[#allocation2] sm:$0xff]  ;;  %s85_s25 = sshll.u32 %s187_s24, 4  ;;  %s87_s28 = sshll.u32 %s223_s3, 4  ;;  %vm78_vm1 = vcmask 523264   ;;  %s86_s25 = int_to_ptr.vmem [resolvable:$true] %s85_s25  ;;  %s88_s28 = int_to_ptr.hbm [resolvable:$true] %s87_s28 }
   0xd   :  { %v104_v5 = vld [vmem:[%s222_s2] ss:$0 sm:$0xff] }
   0xe   :  { %71 = vmatpush.msra.mxu0 %v48_v1 }
  0x10   :  { %72 = vmatpush.msra.mxu0 %v47_v2 }
  0x12   :  { %73 = vmatpush.msra.mxu0 %v46_v3 }
  0x13   :  { %98 = vmatmul.msk.f32.vlgmr.msra.gmra.mxu0 %vm54_vm0, %v45_v4 }
  0x90   :  { %v75_v6 = vpop.f32.mrf.mxu0 }
  0x91   :  { %v76_v7 = vadd.f32 %v104_v5, %v75_v6 }
  0x93   :  { %79 = vst.msk [vmem:[#allocation7] sm:$0xff] %vm78_vm1, %v76_v7 }
  0x94   :  { %90 = dma.vmem_to_hbm [thread:$0]  %s86_s25, 128, %s88_s28, [#allocation4]  }
  0x95   :  { %181 = dma.done.wait [#allocation4], 128  }
  0x96   :  { %182 = vsyncadd [#allocation4], 4294967168 }
  0x97   :  { %95 = vsyncpa [#allocation3], 1 }
  0x98   :  { %96 = vsyncpa [#allocation6], 1 }
  0x99   :  { %97 = vsyncpa [#allocation4], 1 }

</bundles_post_ra>
